<compile_context>
chip_gen: v7x
topology: tpu7x:2x2x1
jax: 0.10.0
libtpu: 0.0.40
codegen_flags: <defaults>
</compile_context>

<pallas_src>
import functools

import jax
import jax.numpy as jnp
from jax import lax
from jax.experimental import pallas as pl
from jax.experimental.pallas import tpu as pltpu


def _round_up(a, m):
    return ((a + m - 1) // m) * m


def _shield_kernel(x_ref,
                   w1_ref, b1_ref,
                   w2_ref, b2_ref,
                   w3_ref, b3_ref,
                   w4_ref, b4_ref,
                   w5_ref, b5_ref,
                   o_ref,
                   *, compute_dtype):
    """Fused 5-layer MLP: 4x (matmul + bias + relu), then fc5 as a packed (1, tb) row."""

    def hidden(h, w_ref, b_ref):
        y = jnp.dot(h.astype(compute_dtype), w_ref[...],
                    preferred_element_type=jnp.float32) + b_ref[...]
        return jnp.maximum(y, 0.0)

    h = x_ref[...]                       # (tb, in_features), already compute_dtype
    h = hidden(h, w1_ref, b1_ref)        # (tb, 128) f32
    h = hidden(h, w2_ref, b2_ref)        # (tb, 64)  f32
    h = hidden(h, w3_ref, b3_ref)        # (tb, 64)  f32
    h = hidden(h, w4_ref, b4_ref)        # (tb, 64)  f32

    # fc5 packed lane-dense: (1, 64) contracted with (tb, 64) on the feature axis
    # (the q @ k.T pattern) -> (1, tb), so the batch index lives on lanes and the
    # output store is an unmasked, lane-dense vst.
    out_row = lax.dot_general(
        w5_ref[...],                     # (1, 64)
        h.astype(compute_dtype),         # (tb, 64)
        dimension_numbers=(((1,), (1,)), ((), ())),
        preferred_element_type=jnp.float32)            # (1, tb)
    o_ref[...] = (out_row + b5_ref[...]).astype(o_ref.dtype)


def shield_forward(x, params, *, block_rows=4096, use_bf16=True):
    """Run the fused Shield MLP kernel.

    x: [batch, input_size] float32
    params: dict with w1..w5 ([in, out]) and b1..b5 ([1, out]).
    Returns [batch, 1] float32.
    """
    batch, in_features = x.shape
    compute_dtype = jnp.bfloat16 if use_bf16 else jnp.float32

    # Batch tile: lane-dense multiple of 128.  For large batches cap at ~half the
    # batch so the "parallel" grid has >= 2 steps (both v7x TensorCores busy) and rely
    # on Pallas partial boundary blocks instead of a host-side pad.  For tiny batches
    # pad to one 128-row tile (negligible copy).
    block_rows = max(128, _round_up(block_rows, 128))
    x_in = x.astype(compute_dtype)
    if batch >= 256:
        tb = min(block_rows, _round_up(pl.cdiv(batch, 2), 128))
    else:
        tb = 128
        padded = _round_up(batch, 128)
        if padded != batch:
            x_in = jnp.pad(x_in, ((0, padded - batch), (0, 0)))
    n_blocks = pl.cdiv(batch, tb)

    # fc5 weight as a (1, 64) row so the kernel can produce the packed (1, tb) output.
    w5_row = params["w5"].reshape(1, -1).astype(compute_dtype)

    weights = (params["w1"].astype(compute_dtype), params["b1"].astype(jnp.float32),
               params["w2"].astype(compute_dtype), params["b2"].astype(jnp.float32),
               params["w3"].astype(compute_dtype), params["b3"].astype(jnp.float32),
               params["w4"].astype(compute_dtype), params["b4"].astype(jnp.float32),
               w5_row, params["b5"].astype(jnp.float32))

    # x / out tiled along the batch grid axis; weights & biases stay VMEM-resident
    # across grid steps (constant index_map).
    x_spec = pl.BlockSpec((tb, in_features), lambda i: (i, 0))
    resident_specs = [pl.BlockSpec(w.shape, lambda i: (0, 0)) for w in weights]
    out_spec = pl.BlockSpec((1, tb), lambda i: (i, 0))

    flops = 2 * batch * (in_features * 128 + 128 * 64 + 64 * 64 + 64 * 64 + 64 * 1)
    bytes_accessed = (int(x_in.size) * x_in.dtype.itemsize
                      + sum(int(w.size) * w.dtype.itemsize for w in weights)
                      + n_blocks * tb * 4)

    out_rows = pl.pallas_call(
        functools.partial(_shield_kernel, compute_dtype=compute_dtype),
        out_shape=jax.ShapeDtypeStruct((n_blocks, tb), jnp.float32),
        grid=(n_blocks,),
        in_specs=[x_spec] + resident_specs,
        out_specs=out_spec,
        compiler_params=pltpu.CompilerParams(
            dimension_semantics=("parallel",),
            vmem_limit_bytes=32 * 1024 * 1024),
        cost_estimate=pl.CostEstimate(
            flops=flops, transcendentals=0, bytes_accessed=bytes_accessed),
    )(x_in, *weights)

    # Row-major (n_blocks, tb) -> (n_blocks * tb, 1) is a free reshape; slice off
    # any tail rows belonging to the partial last block.
    return out_rows.reshape(n_blocks * tb, 1)[:batch]


def init_params(key, input_size):
    """Deterministic init mirroring PyTorch nn.Linear default (uniform +/- 1/sqrt(fan_in))."""
    sizes = [(input_size, 128), (128, 64), (64, 64), (64, 64), (64, 1)]
    params = {}
    for i, (fan_in, fan_out) in enumerate(sizes, start=1):
        key, kw, kb = jax.random.split(key, 3)
        bound = 1.0 / jnp.sqrt(jnp.float32(fan_in))
        params[f"w{i}"] = jax.random.uniform(
            kw, (fan_in, fan_out), jnp.float32, -bound, bound)
        params[f"b{i}"] = jax.random.uniform(
            kb, (1, fan_out), jnp.float32, -bound, bound)
    return params


def shield_forward_ref(x, params):
    """Pure-JAX reference for correctness checking."""
    h = x
    for i in range(1, 5):
        h = jnp.maximum(h @ params[f"w{i}"] + params[f"b{i}"], 0.0)
    return h @ params["w5"] + params["b5"]


if __name__ == "__main__":
    key = jax.random.PRNGKey(0)
    input_size = 32   # state_dim + action_dim for the synthetic Shield
    batch = 8

    kx, kp = jax.random.split(key)
    x = jax.random.normal(kx, (batch, input_size), jnp.float32)
    params = init_params(kp, input_size)

    ref = shield_forward_ref(x, params)

    # f32 MXU path (tight tolerance vs reference).
    out_f32 = jax.block_until_ready(shield_forward(x, params, use_bf16=False))
    assert out_f32.shape == (batch, 1), out_f32.shape
    assert jnp.allclose(out_f32, ref, atol=1e-3, rtol=1e-3), "f32 path mismatch vs reference"

    # Default bf16-matmul path (MXU-native on v5e/v6e/v7x); loose tolerance since
    # x and weights are cast to bf16 in the wrapper (accumulation stays f32).
    out_bf16 = jax.block_until_ready(shield_forward(x, params))
    assert out_bf16.shape == (batch, 1), out_bf16.shape
    assert jnp.allclose(out_bf16, ref, atol=5e-2, rtol=5e-2), "bf16 path drifted too far"

    print("KERNEL_OK")
</pallas_src>

<mosaic_0001>
module attributes {stable_mosaic.version = 11 : i64} {
  func.func @_shield_kernel(%arg0: i32, %arg1: memref<128x32xf32, #tpu.memory_space<vmem>>, %arg2: memref<32x128xf32, #tpu.memory_space<vmem>>, %arg3: memref<1x128xf32, #tpu.memory_space<vmem>>, %arg4: memref<128x64xf32, #tpu.memory_space<vmem>>, %arg5: memref<1x64xf32, #tpu.memory_space<vmem>>, %arg6: memref<64x64xf32, #tpu.memory_space<vmem>>, %arg7: memref<1x64xf32, #tpu.memory_space<vmem>>, %arg8: memref<64x64xf32, #tpu.memory_space<vmem>>, %arg9: memref<1x64xf32, #tpu.memory_space<vmem>>, %arg10: memref<1x64xf32, #tpu.memory_space<vmem>>, %arg11: memref<1x1xf32, #tpu.memory_space<vmem>>, %arg12: memref<1x128xf32, #tpu.memory_space<vmem>>) attributes {dimension_semantics = [#tpu.dimension_semantics<parallel>], iteration_bounds = array<i64: 1>, scalar_prefetch = 0 : i64, scratch_operands = 0 : i64, tpu.core_type = #tpu.core_type<tc>, window_params = [{transform_indices = @transform_0, window_bounds = array<i64: 128, 32>}, {pipeline_mode = #tpu.pipeline_mode<synchronous>, transform_indices = @transform_1, window_bounds = array<i64: 32, 128>}, {pipeline_mode = #tpu.pipeline_mode<synchronous>, transform_indices = @transform_2, window_bounds = array<i64: 1, 128>}, {pipeline_mode = #tpu.pipeline_mode<synchronous>, transform_indices = @transform_3, window_bounds = array<i64: 128, 64>}, {pipeline_mode = #tpu.pipeline_mode<synchronous>, transform_indices = @transform_4, window_bounds = array<i64: 1, 64>}, {pipeline_mode = #tpu.pipeline_mode<synchronous>, transform_indices = @transform_5, window_bounds = array<i64: 64, 64>}, {pipeline_mode = #tpu.pipeline_mode<synchronous>, transform_indices = @transform_6, window_bounds = array<i64: 1, 64>}, {pipeline_mode = #tpu.pipeline_mode<synchronous>, transform_indices = @transform_7, window_bounds = array<i64: 64, 64>}, {pipeline_mode = #tpu.pipeline_mode<synchronous>, transform_indices = @transform_8, window_bounds = array<i64: 1, 64>}, {pipeline_mode = #tpu.pipeline_mode<synchronous>, transform_indices = @transform_9, window_bounds = array<i64: 1, 64>}, {pipeline_mode = #tpu.pipeline_mode<synchronous>, transform_indices = @transform_10, window_bounds = array<i64: 1, 1>}, {transform_indices = @transform_11, window_bounds = array<i64: 1, 128>}]} {
    %c0 = arith.constant 0 : index
    %c0_0 = arith.constant 0 : index
    %0 = vector.load %arg1[%c0, %c0_0] : memref<128x32xf32, #tpu.memory_space<vmem>>, vector<128x32xf32>
    %c0_1 = arith.constant 0 : index
    %c0_2 = arith.constant 0 : index
    %1 = vector.load %arg2[%c0_1, %c0_2] : memref<32x128xf32, #tpu.memory_space<vmem>>, vector<32x128xf32>
    %cst = arith.constant dense<0.000000e+00> : vector<128x128xf32>
    %2 = tpu.matmul %0, %1, %cst {dimension_numbers = #tpu.dot_dimension_numbers<[1], [0], [0], [1], [0, 0, 1, 1], [], []>} : vector<128x32xf32>, vector<32x128xf32>, vector<128x128xf32> -> vector<128x128xf32>
    %c0_3 = arith.constant 0 : index
    %c0_4 = arith.constant 0 : index
    %3 = vector.load %arg3[%c0_3, %c0_4] : memref<1x128xf32, #tpu.memory_space<vmem>>, vector<1x128xf32>
    %4 = vector.broadcast %3 : vector<1x128xf32> to vector<128x128xf32>
    %5 = arith.addf %2, %4 : vector<128x128xf32>
    %cst_5 = arith.constant 0.000000e+00 : f32
    %6 = vector.broadcast %cst_5 : f32 to vector<128x128xf32>
    %7 = arith.maximumf %5, %6 : vector<128x128xf32>
    %c0_6 = arith.constant 0 : index
    %c0_7 = arith.constant 0 : index
    %8 = vector.load %arg4[%c0_6, %c0_7] : memref<128x64xf32, #tpu.memory_space<vmem>>, vector<128x64xf32>
    %cst_8 = arith.constant dense<0.000000e+00> : vector<128x64xf32>
    %9 = tpu.matmul %7, %8, %cst_8 {dimension_numbers = #tpu.dot_dimension_numbers<[1], [0], [0], [1], [0, 0, 1, 1], [], []>} : vector<128x128xf32>, vector<128x64xf32>, vector<128x64xf32> -> vector<128x64xf32>
    %c0_9 = arith.constant 0 : index
    %c0_10 = arith.constant 0 : index
    %10 = vector.load %arg5[%c0_9, %c0_10] : memref<1x64xf32, #tpu.memory_space<vmem>>, vector<1x64xf32>
    %11 = vector.broadcast %10 : vector<1x64xf32> to vector<128x64xf32>
    %12 = arith.addf %9, %11 : vector<128x64xf32>
    %cst_11 = arith.constant 0.000000e+00 : f32
    %13 = vector.broadcast %cst_11 : f32 to vector<128x64xf32>
    %14 = arith.maximumf %12, %13 : vector<128x64xf32>
    %c0_12 = arith.constant 0 : index
    %c0_13 = arith.constant 0 : index
    %15 = vector.load %arg6[%c0_12, %c0_13] : memref<64x64xf32, #tpu.memory_space<vmem>>, vector<64x64xf32>
    %cst_14 = arith.constant dense<0.000000e+00> : vector<128x64xf32>
    %16 = tpu.matmul %14, %15, %cst_14 {dimension_numbers = #tpu.dot_dimension_numbers<[1], [0], [0], [1], [0, 0, 1, 1], [], []>} : vector<128x64xf32>, vector<64x64xf32>, vector<128x64xf32> -> vector<128x64xf32>
    %c0_15 = arith.constant 0 : index
    %c0_16 = arith.constant 0 : index
    %17 = vector.load %arg7[%c0_15, %c0_16] : memref<1x64xf32, #tpu.memory_space<vmem>>, vector<1x64xf32>
    %18 = vector.broadcast %17 : vector<1x64xf32> to vector<128x64xf32>
    %19 = arith.addf %16, %18 : vector<128x64xf32>
    %cst_17 = arith.constant 0.000000e+00 : f32
    %20 = vector.broadcast %cst_17 : f32 to vector<128x64xf32>
    %21 = arith.maximumf %19, %20 : vector<128x64xf32>
    %c0_18 = arith.constant 0 : index
    %c0_19 = arith.constant 0 : index
    %22 = vector.load %arg8[%c0_18, %c0_19] : memref<64x64xf32, #tpu.memory_space<vmem>>, vector<64x64xf32>
    %cst_20 = arith.constant dense<0.000000e+00> : vector<128x64xf32>
    %23 = tpu.matmul %21, %22, %cst_20 {dimension_numbers = #tpu.dot_dimension_numbers<[1], [0], [0], [1], [0, 0, 1, 1], [], []>} : vector<128x64xf32>, vector<64x64xf32>, vector<128x64xf32> -> vector<128x64xf32>
    %c0_21 = arith.constant 0 : index
    %c0_22 = arith.constant 0 : index
    %24 = vector.load %arg9[%c0_21, %c0_22] : memref<1x64xf32, #tpu.memory_space<vmem>>, vector<1x64xf32>
    %25 = vector.broadcast %24 : vector<1x64xf32> to vector<128x64xf32>
    %26 = arith.addf %23, %25 : vector<128x64xf32>
    %cst_23 = arith.constant 0.000000e+00 : f32
    %27 = vector.broadcast %cst_23 : f32 to vector<128x64xf32>
    %28 = arith.maximumf %26, %27 : vector<128x64xf32>
    %c0_24 = arith.constant 0 : index
    %c0_25 = arith.constant 0 : index
    %29 = vector.load %arg10[%c0_24, %c0_25] : memref<1x64xf32, #tpu.memory_space<vmem>>, vector<1x64xf32>
    %cst_26 = arith.constant dense<0.000000e+00> : vector<1x128xf32>
    %30 = tpu.matmul %29, %28, %cst_26 {dimension_numbers = #tpu.dot_dimension_numbers<[1], [1], [0], [0], [0, 0, 1, 0], [], []>} : vector<1x64xf32>, vector<128x64xf32>, vector<1x128xf32> -> vector<1x128xf32>
    %c0_27 = arith.constant 0 : index
    %c0_28 = arith.constant 0 : index
    %31 = vector.load %arg11[%c0_27, %c0_28] : memref<1x1xf32, #tpu.memory_space<vmem>>, vector<1x1xf32>
    %32 = vector.broadcast %31 : vector<1x1xf32> to vector<1x128xf32>
    %33 = arith.addf %30, %32 : vector<1x128xf32>
    %c0_29 = arith.constant 0 : index
    %c0_30 = arith.constant 0 : index
    %34 = vector.load %arg12[%c0_29, %c0_30] : memref<1x128xf32, #tpu.memory_space<vmem>>, vector<1x128xf32>
    tpu.vector_store %arg12[%c0_29, %c0_30], %33 {strides = array<i32>} : memref<1x128xf32, #tpu.memory_space<vmem>>, vector<1x128xf32>,
    return
  }
  func.func @transform_0(%arg0: i32) -> (i32, i32) {
    %c0_i32 = arith.constant 0 : i32
    %c0_i32_0 = arith.constant 0 : i32
    return %arg0, %c0_i32 : i32, i32
  }
  func.func @transform_1(%arg0: i32) -> (i32, i32) {
    %c0_i32 = arith.constant 0 : i32
    %c0_i32_0 = arith.constant 0 : i32
    %c0_i32_1 = arith.constant 0 : i32
    return %c0_i32, %c0_i32_0 : i32, i32
  }
  func.func @transform_2(%arg0: i32) -> (i32, i32) {
    %c0_i32 = arith.constant 0 : i32
    %c0_i32_0 = arith.constant 0 : i32
    %c0_i32_1 = arith.constant 0 : i32
    return %c0_i32, %c0_i32_0 : i32, i32
  }
  func.func @transform_3(%arg0: i32) -> (i32, i32) {
    %c0_i32 = arith.constant 0 : i32
    %c0_i32_0 = arith.constant 0 : i32
    %c0_i32_1 = arith.constant 0 : i32
    return %c0_i32, %c0_i32_0 : i32, i32
  }
  func.func @transform_4(%arg0: i32) -> (i32, i32) {
    %c0_i32 = arith.constant 0 : i32
    %c0_i32_0 = arith.constant 0 : i32
    %c0_i32_1 = arith.constant 0 : i32
    return %c0_i32, %c0_i32_0 : i32, i32
  }
  func.func @transform_5(%arg0: i32) -> (i32, i32) {
    %c0_i32 = arith.constant 0 : i32
    %c0_i32_0 = arith.constant 0 : i32
    %c0_i32_1 = arith.constant 0 : i32
    return %c0_i32, %c0_i32_0 : i32, i32
  }
  func.func @transform_6(%arg0: i32) -> (i32, i32) {
    %c0_i32 = arith.constant 0 : i32
    %c0_i32_0 = arith.constant 0 : i32
    %c0_i32_1 = arith.constant 0 : i32
    return %c0_i32, %c0_i32_0 : i32, i32
  }
  func.func @transform_7(%arg0: i32) -> (i32, i32) {
    %c0_i32 = arith.constant 0 : i32
    %c0_i32_0 = arith.constant 0 : i32
    %c0_i32_1 = arith.constant 0 : i32
    return %c0_i32, %c0_i32_0 : i32, i32
  }
  func.func @transform_8(%arg0: i32) -> (i32, i32) {
    %c0_i32 = arith.constant 0 : i32
    %c0_i32_0 = arith.constant 0 : i32
    %c0_i32_1 = arith.constant 0 : i32
    return %c0_i32, %c0_i32_0 : i32, i32
  }
  func.func @transform_9(%arg0: i32) -> (i32, i32) {
    %c0_i32 = arith.constant 0 : i32
    %c0_i32_0 = arith.constant 0 : i32
    %c0_i32_1 = arith.constant 0 : i32
    return %c0_i32, %c0_i32_0 : i32, i32
  }
  func.func @transform_10(%arg0: i32) -> (i32, i32) {
    %c0_i32 = arith.constant 0 : i32
    %c0_i32_0 = arith.constant 0 : i32
    %c0_i32_1 = arith.constant 0 : i32
    return %c0_i32, %c0_i32_0 : i32, i32
  }
  func.func @transform_11(%arg0: i32) -> (i32, i32) {
    %c0_i32 = arith.constant 0 : i32
    %c0_i32_0 = arith.constant 0 : i32
    return %arg0, %c0_i32 : i32, i32
  }
}

</mosaic_0001>

<bundles_post_ra>
// kernel: tpu_custom_call.1
= control target key start
LH: loop header
LB: loop body
LE: loop exit
PB: predicated region body
PF: predicated region fallthrough
CT: control target
= control target key end

     0   :  { %s1911_s0 = inlined_call_operand.vmem [shape: f32[128,32], index: 0, kind: input, shape index: {}]   ;;  %s1912_s1 = inlined_call_operand.vmem [shape: f32[32,128], index: 1, kind: input, shape index: {}]   ;;  %s1913_s2 = inlined_call_operand.vmem [shape: f32[1,128], index: 2, kind: input, shape index: {}]   ;;  %s1914_s3 = inlined_call_operand.vmem [shape: f32[128,64], index: 3, kind: input, shape index: {}]   ;;  %s1915_s4 = inlined_call_operand.vmem [shape: f32[1,64], index: 4, kind: input, shape index: {}]   ;;  %s1916_s5 = inlined_call_operand.vmem [shape: f32[64,64], index: 5, kind: input, shape index: {}]   ;;  %s1917_s6 = inlined_call_operand.vmem [shape: f32[1,64], index: 6, kind: input, shape index: {}]   ;;  %s1918_s7 = inlined_call_operand.vmem [shape: f32[64,64], index: 7, kind: input, shape index: {}]   ;;  %s1919_s8 = inlined_call_operand.vmem [shape: f32[1,64], index: 8, kind: input, shape index: {}]   ;;  %s1920_s9 = inlined_call_operand.vmem [shape: f32[1,64], index: 9, kind: input, shape index: {}]   ;;  %s1921_s10 = inlined_call_operand.<no memory space> [shape: f32[1,1], index: 10, kind: input, shape index: {}]   ;;  %s1922_s11 = inlined_call_operand.hbm [shape: f32[1,128], index: 11, kind: output, shape index: {}]  }
   0x1   :  { %v16_v0 = vstv %s1921_s10 }
   0x2   :  { %17 = vst [vmem:[#allocation2] sm:$0x1] %v16_v0 }
   0x3   :  { %v57_v1 = vld [vmem:[%s1912_s1] sm:$0xff]  ;;  %v58_v2 = vld [vmem:[%s1912_s1 + $0x8] sm:$0xff]  ;;  %v59_v3 = vld [vmem:[%s1912_s1 + $0x10] sm:$0xff]  ;;  %vm68_vm0 = vcmask 261120  }
   0x4   :  { %v1447_v4 = vpack.c.bf16 %v58_v2, %v57_v1  ;;  %v60_v5 = vld [vmem:[%s1912_s1 + $0x18] sm:$0xff]  ;;  %v41_v6 = vld [vmem:[%s1911_s0] sm:$0xff]  ;;  %v279_v9 = vld [vmem:[%s1914_s3 + $0x8] sm:$0xff] }
   0x5   :  { %v1451_v7 = vpack.c.bf16 %v60_v5, %v59_v3  ;;  %1252 = vmatprep.mubr.msk.f32.mxu1 %vm68_vm0, %v41_v6  ;;  %v278_v8 = vld [vmem:[%s1914_s3] sm:$0xff]  ;;  %v280_v10 = vld [vmem:[%s1914_s3 + $0x10] sm:$0xff]  ;;  %v281_v11 = vld [vmem:[%s1914_s3 + $0x18] sm:$0xff] }
   0x6   :  { %1448 = vmatprep.subr.bf16.mxu1 %v1447_v4  ;;  %v42_v12 = vld [vmem:[%s1911_s0 + $0x8] sm:$0xff]  ;;  %v1455_v13 = vpack.c.bf16 %v279_v9, %v278_v8  ;;  %v43_v14 = vld [vmem:[%s1911_s0 + $0x10] sm:$0xff]  ;;  %v1459_v15 = vpack.c.bf16 %v281_v11, %v280_v10  ;;  %v282_v16 = vld [vmem:[%s1914_s3 + $0x20] sm:$0xff] }
   0x7   :  { %1450 = vmatpush3.bf16.msra.mxu1 %v1447_v4  ;;  %v283_v17 = vld [vmem:[%s1914_s3 + $0x28] sm:$0xff] }
   0x8   :  { %1452 = vmatprep.subr.bf16.mxu1 %v1451_v7 }
   0xb   :  { %1454 = vmatpush3.bf16.msra.mxu1 %v1451_v7 }
   0xc   :  { %1456 = vmatprep.subr.bf16.mxu1 %v1455_v13 }
   0xe   :  { %1253 = vmatmul.mubr.msk.f32.vlgmr.msra.gmra.mrb[0].mxu1 %vm68_vm0, %v42_v12 }
   0xf   :  { %18 = vsyncpa [#allocation4], 0  ;;  %1255 = vmatprep.mubr.msk.f32.mxu1 %vm68_vm0, %v43_v14  ;;  %v44_v18 = vld [vmem:[%s1911_s0 + $0x18] sm:$0xff]  ;;  %1458 = vmatpush3.bf16.msra.mxu1 %v1455_v13  ;;  %v45_v19 = vld [vmem:[%s1911_s0 + $0x20] sm:$0xff]  ;;  %v1463_v20 = vpack.c.bf16 %v283_v17, %v282_v16  ;;  %vm477_vm1 = vcmask 523264   ;;  %vm1582_vm2 = vmmov 0  }
  0x10   :  { %1460 = vmatprep.subr.bf16.mxu1 %v1459_v15  ;;  %v284_v21 = vld [vmem:[%s1914_s3 + $0x30] sm:$0xff]  ;;  %v285_v22 = vld [vmem:[%s1914_s3 + $0x38] sm:$0xff]  ;;  %v46_v23 = vld [vmem:[%s1911_s0 + $0x28] sm:$0xff]  ;;  %s1585_s18 = smov [#allocation3]  }
  0x11   :  { %v47_v24 = vld [vmem:[%s1911_s0 + $0x30] sm:$0xff]  ;;  %v1467_v25 = vpack.c.bf16 %v285_v22, %v284_v21  ;;  %v286_v26 = vld [vmem:[%s1914_s3 + $0x40] sm:$0xff]  ;;  %v287_v27 = vld [vmem:[%s1914_s3 + $0x48] sm:$0xff] }
  0x12   :  { %1256 = vmatmul.mubr.msk.f32.gmra.mrb[2].mxu1 %vm68_vm0, %v44_v18  ;;  %v48_v28 = vld [vmem:[%s1911_s0 + $0x38] sm:$0xff]  ;;  %v49_v29 = vld [vmem:[%s1911_s0 + $0x40] sm:$0xff]  ;;  %v1471_v30 = vpack.c.bf16 %v287_v27, %v286_v26  ;;  %v288_v31 = vld [vmem:[%s1914_s3 + $0x50] sm:$0xff] }
  0x13   :  { %1258 = vmatprep.mubr.msk.f32.mxu1 %vm68_vm0, %v45_v19  ;;  %1462 = vmatpush3.bf16.msra.mxu1 %v1459_v15  ;;  %v289_v32 = vld [vmem:[%s1914_s3 + $0x58] sm:$0xff]  ;;  %v50_v33 = vld [vmem:[%s1911_s0 + $0x48] sm:$0xff]  ;;  %v51_v34 = vld [vmem:[%s1911_s0 + $0x50] sm:$0xff] }
  0x14   :  { %1464 = vmatprep.subr.bf16.mxu1 %v1463_v20  ;;  %v1475_v35 = vpack.c.bf16 %v289_v32, %v288_v31  ;;  %v290_v36 = vld [vmem:[%s1914_s3 + $0x60] sm:$0xff]  ;;  %v291_v37 = vld [vmem:[%s1914_s3 + $0x68] sm:$0xff]  ;;  %v52_v38 = vld [vmem:[%s1911_s0 + $0x58] sm:$0xff] }
  0x15   :  { %v53_v39 = vld [vmem:[%s1911_s0 + $0x60] sm:$0xff]  ;;  %v1479_v40 = vpack.c.bf16 %v291_v37, %v290_v36  ;;  %v54_v41 = vld [vmem:[%s1911_s0 + $0x68] sm:$0xff]  ;;  %v55_v42 = vld [vmem:[%s1911_s0 + $0x70] sm:$0xff] }
  0x16   :  { %1259 = vmatmul.mubr.msk.f32.gmra.mrb[4].mxu1 %vm68_vm0, %v46_v23  ;;  %v56_v43 = vld [vmem:[%s1911_s0 + $0x78] sm:$0xff]  ;;  %v292_v44 = vld [vmem:[%s1914_s3 + $0x70] sm:$0xff]  ;;  %v462_v47 = vld [vmem:[%s1916_s5] sm:$0xff] }
  0x17   :  { %1261 = vmatprep.mubr.msk.f32.mxu1 %vm68_vm0, %v47_v24  ;;  %1466 = vmatpush3.bf16.msra.mxu1 %v1463_v20  ;;  %v293_v45 = vld [vmem:[%s1914_s3 + $0x78] sm:$0xff]  ;;  %v463_v48 = vld [vmem:[%s1916_s5 + $0x8] sm:$0xff]  ;;  %v464_v49 = vld [vmem:[%s1916_s5 + $0x10] sm:$0xff] }
  0x18   :  { %1468 = vmatprep.subr.bf16.mxu1 %v1467_v25  ;;  %v1483_v46 = vpack.c.bf16 %v293_v45, %v292_v44  ;;  %v1487_v50 = vpack.c.bf16 %v463_v48, %v462_v47  ;;  %v465_v51 = vld [vmem:[%s1916_s5 + $0x18] sm:$0xff]  ;;  %v466_v53 = vld [vmem:[%s1916_s5 + $0x20] sm:$0xff]  ;;  %v467_v54 = vld [vmem:[%s1916_s5 + $0x28] sm:$0xff] }
  0x19   :  { %v1491_v52 = vpack.c.bf16 %v465_v51, %v464_v49  ;;  %v1495_v55 = vpack.c.bf16 %v467_v54, %v466_v53  ;;  %v1058_v56 = vld [vmem:[%s1913_s2] ss:$0 sm:$0xff]  ;;  %v688_v45 = vld [vmem:[%s1918_s7 + $0x8] sm:$0xff]  ;;  %v690_v48 = vld [vmem:[%s1918_s7 + $0x18] sm:$0xff]  ;;  %s1050_s2 = sshll.u32 %s1585_s18, 4  ;;  %s1051_s2 = int_to_ptr.vmem [resolvable:$true] %s1050_s2 }
  0x1a   :  { %1262 = vmatmul.mubr.msk.f32.gmra.mrb[6].mxu1 %vm68_vm0, %v48_v28  ;;  %1488 = vmatprep.subr.bf16.mxu0 %v1487_v50  ;;  %v687_v44 = vld [vmem:[%s1918_s7] sm:$0xff]  ;;  %v692_v51 = vld [vmem:[%s1918_s7 + $0x28] sm:$0xff]  ;;  %v693_v53 = vld [vmem:[%s1918_s7 + $0x30] sm:$0xff]  ;;  %s1557_s19 = scalar_lea.vmem %s1051_s2, 16  ;;  %s1561_s20 = scalar_lea.vmem %s1051_s2, 32 }
  0x1b   :  { %1264 = vmatprep.mubr.msk.f32.mxu1 %vm68_vm0, %v49_v29  ;;  %1470 = vmatpush3.bf16.msra.mxu1 %v1467_v25  ;;  %v1503_v47 = vpack.c.bf16 %v688_v45, %v687_v44  ;;  %v694_v54 = vld [vmem:[%s1918_s7 + $0x38] sm:$0xff]  ;;  %vm1868_vm3 = vmpackc.low %vm477_vm1, %vm477_vm1  ;;  %p1558_p0 = scmp.ne.s32.totalorder %s1051_s2, %s1557_s19  ;;  %p1562_p1 = scmp.lt.s32.totalorder %s1051_s2, %s1051_s2 }
  0x1c   :  { %1472 = vmatprep.subr.bf16.mxu1 %v1471_v30  ;;  %1490 = vmatpush3.bf16.msra.mxu0 %v1487_v50  ;;  %v691_v50 = vld [vmem:[%s1918_s7 + $0x20] sm:$0xff]  ;;  %p1563_p2 = scmp.lt.s32.totalorder %s1561_s20, %s1557_s19 }
  0x1d   :  { %1492 = vmatprep.subr.bf16.mxu0 %v1491_v52 }
  0x1e   :  { %1265 = vmatmul.mubr.msk.f32.gmra.mrb[8].mxu1 %vm68_vm0, %v50_v33  ;;  %p1564_p3 = por %p1563_p2, %p1562_p1 }
  0x1f   :  { %1267 = vmatprep.mubr.msk.f32.mxu1 %vm68_vm0, %v51_v34  ;;  %1474 = vmatpush3.bf16.msra.mxu1 %v1471_v30 }
  0x20   :  { %1476 = vmatprep.subr.bf16.mxu1 %v1475_v35  ;;  %1494 = vmatpush3.bf16.msra.mxu0 %v1491_v52  ;;  %v1511_v52 = vpack.c.bf16 %v692_v51, %v691_v50  ;;  %p1565_p4 = pnand %p1564_p3, %p1558_p0 }
  0x21   :  { %1496 = vmatprep.subr.bf16.mxu0 %v1495_v55 }
  0x22   :  { %1268 = vmatmul.mubr.msk.f32.gmra.mrb[10].mxu1 %vm68_vm0, %v52_v38 }
  0x23   :  { %1270 = vmatprep.mubr.msk.f32.mxu1 %vm68_vm0, %v53_v39  ;;  %1478 = vmatpush3.bf16.msra.mxu1 %v1475_v35 }
  0x24   :  { %1480 = vmatprep.subr.bf16.mxu1 %v1479_v40  ;;  %1498 = vmatpush3.bf16.msra.mxu0 %v1495_v55  ;;  %v1515_v55 = vpack.c.bf16 %v694_v54, %v693_v53 }
  0x26   :  { %1271 = vmatmul.mubr.msk.f32.gmra.mrb[12].mxu1 %vm68_vm0, %v54_v41  ;;  %v468_v41 = vld [vmem:[%s1916_s5 + $0x30] sm:$0xff] }
  0x27   :  { %1273 = vmatprep.mubr.msk.f32.mxu1 %vm68_vm0, %v55_v42  ;;  %1482 = vmatpush3.bf16.msra.mxu1 %v1479_v40  ;;  %v469_v42 = vld [vmem:[%s1916_s5 + $0x38] sm:$0xff] }
  0x28   :  { %1484 = vmatprep.subr.bf16.mxu1 %v1483_v46 }
  0x2a   :  { %1274 = vmatmul.mubr.msk.f32.gmra.mrb[14].mxu1 %vm68_vm0, %v56_v43  ;;  %v1499_v43 = vpack.c.bf16 %v469_v42, %v468_v41  ;;  %v1076_v41 = vld [vmem:[%s1917_s6] ss:$0 sm:$0xff] }
  0x2b   :  { %1486 = vmatpush3.bf16.msra.mxu1 %v1483_v46  ;;  %v689_v46 = vld [vmem:[%s1918_s7 + $0x10] sm:$0xff] }
  0x2c   :  { %1500 = vmatprep.subr.bf16.mxu0 %v1499_v43  ;;  %v1507_v49 = vpack.c.bf16 %v690_v48, %v689_v46  ;;  %1504 = vmatprep.subr.bf16.mxu1 %v1503_v47 }
  0x2d   :  { %1502 = vmatpush3.bf16.msra.mxu0 %v1499_v43 }
  0xe1   :  { %v1254_v57 = vpop.f32.mrb[0].mxu1 }
  0xe2   :  { %v189_v58 = vadd.f32 %v1254_v57, %v1058_v56  ;;  %v183_v59 = vpop.f32.mrb[1].mxu1 }
  0xe3   :  { %v184_v60 = vadd.f32 %v1058_v56, %v183_v59 }
  0xe4   :  { %v263_v63 = vmax.f32 %v189_v58, 0.0 }
  0xe5   :  { %v262_v61 = vmax.f32 %v184_v60, 0.0  ;;  %v1257_v62 = vpop.f32.mrb[2].mxu1 }
  0xe6   :  { %v199_v0 = vadd.f32 %v1257_v62, %v1058_v56  ;;  %v193_v1 = vpop.f32.mrb[3].mxu1 }
  0xe7   :  { %v194_v2 = vadd.f32 %v1058_v56, %v193_v1  ;;  %1308 = vmatprep.mubr.f32.mxu1 %v262_v61 }
  0xe8   :  { %v265_v3 = vmax.f32 %v199_v0, 0.0  ;;  %1309 = vmatmul.mubr.f32.vlgmr.msra.gmra.mrb[16].mxu1 %v263_v63 }
  0xe9   :  { %v264_v4 = vmax.f32 %v194_v2, 0.0  ;;  %v1260_v5 = vpop.f32.mrb[4].mxu1  ;;  %1506 = vmatpush3.bf16.msra.mxu1 %v1503_v47 }
  0xea   :  { %v209_v6 = vadd.f32 %v1260_v5, %v1058_v56  ;;  %v203_v7 = vpop.f32.mrb[5].mxu1  ;;  %1508 = vmatprep.subr.bf16.mxu1 %v1507_v49 }
  0xeb   :  { %v204_v8 = vadd.f32 %v1058_v56, %v203_v7  ;;  %1311 = vmatprep.mubr.f32.mxu1 %v264_v4 }
  0xec   :  { %v267_v9 = vmax.f32 %v209_v6, 0.0  ;;  %1312 = vmatmul.mubr.f32.gmra.mrb[18].mxu1 %v265_v3 }
  0xed   :  { %v266_v10 = vmax.f32 %v204_v8, 0.0  ;;  %v1263_v11 = vpop.f32.mrb[6].mxu1  ;;  %1510 = vmatpush3.bf16.msra.mxu1 %v1507_v49 }
  0xee   :  { %v219_v12 = vadd.f32 %v1263_v11, %v1058_v56  ;;  %v213_v13 = vpop.f32.mrb[7].mxu1  ;;  %1512 = vmatprep.subr.bf16.mxu1 %v1511_v52 }
  0xef   :  { %1314 = vmatprep.mubr.f32.mxu1 %v266_v10  ;;  %v214_v14 = vadd.f32 %v1058_v56, %v213_v13 }
  0xf0   :  { %1315 = vmatmul.mubr.f32.gmra.mrb[20].mxu1 %v267_v9  ;;  %v269_v15 = vmax.f32 %v219_v12, 0.0 }
  0xf1   :  { %v268_v16 = vmax.f32 %v214_v14, 0.0  ;;  %v1266_v17 = vpop.f32.mrb[8].mxu1  ;;  %1514 = vmatpush3.bf16.msra.mxu1 %v1511_v52 }
  0xf2   :  { %v229_v18 = vadd.f32 %v1266_v17, %v1058_v56  ;;  %v223_v19 = vpop.f32.mrb[9].mxu1  ;;  %1516 = vmatprep.subr.bf16.mxu1 %v1515_v55 }
  0xf3   :  { %1317 = vmatprep.mubr.f32.mxu1 %v268_v16  ;;  %v224_v20 = vadd.f32 %v1058_v56, %v223_v19 }
  0xf4   :  { %1318 = vmatmul.mubr.f32.gmra.mrb[22].mxu1 %v269_v15  ;;  %v271_v21 = vmax.f32 %v229_v18, 0.0 }
  0xf5   :  { %v270_v22 = vmax.f32 %v224_v20, 0.0  ;;  %v1269_v23 = vpop.f32.mrb[10].mxu1  ;;  %1518 = vmatpush3.bf16.msra.mxu1 %v1515_v55 }
  0xf6   :  { %v239_v24 = vadd.f32 %v1269_v23, %v1058_v56  ;;  %v233_v25 = vpop.f32.mrb[11].mxu1 }
  0xf7   :  { %1320 = vmatprep.mubr.f32.mxu1 %v270_v22  ;;  %v234_v26 = vadd.f32 %v1058_v56, %v233_v25 }
  0xf8   :  { %1321 = vmatmul.mubr.f32.gmra.mrb[24].mxu1 %v271_v21  ;;  %v273_v27 = vmax.f32 %v239_v24, 0.0 }
  0xf9   :  { %v272_v28 = vmax.f32 %v234_v26, 0.0  ;;  %v1272_v29 = vpop.f32.mrb[12].mxu1 }
  0xfa   :  { %v249_v30 = vadd.f32 %v1272_v29, %v1058_v56  ;;  %v243_v31 = vpop.f32.mrb[13].mxu1 }
  0xfb   :  { %1323 = vmatprep.mubr.f32.mxu1 %v272_v28  ;;  %v244_v32 = vadd.f32 %v1058_v56, %v243_v31 }
  0xfc   :  { %1324 = vmatmul.mubr.f32.gmra.mrb[26].mxu1 %v273_v27  ;;  %v275_v33 = vmax.f32 %v249_v30, 0.0 }
  0xfd   :  { %v274_v34 = vmax.f32 %v244_v32, 0.0  ;;  %v1275_v35 = vpop.f32.mrb[14].mxu1 }
  0xfe   :  { %v259_v36 = vadd.f32 %v1275_v35, %v1058_v56  ;;  %v253_v37 = vpop.f32.mrb[15].mxu1 }
  0xff   :  { %1326 = vmatprep.mubr.f32.mxu1 %v274_v34  ;;  %v254_v38 = vadd.f32 %v1058_v56, %v253_v37  ;;  %v1075_v56 = vld [vmem:[%s1915_s4] ss:$0 sm:$0xff] }
 0x100   :  { %1327 = vmatmul.mubr.f32.gmra.mrb[28].mxu1 %v275_v33  ;;  %v277_v39 = vmax.f32 %v259_v36, 0.0 }
 0x101   :  { %v276_v40 = vmax.f32 %v254_v38, 0.0 }
 0x103   :  { %1329 = vmatprep.mubr.f32.mxu1 %v276_v40 }
 0x104   :  { %1330 = vmatmul.mubr.f32.gmra.mrb[30].mxu1 %v277_v39 }
 0x1bb   :  { %v1310_v57 = vpop.f32.mrb[16].mxu1 }
 0x1bc   :  { %v373_v58 = vadd.f32 %v1310_v57, %v1075_v56  ;;  %v367_v59 = vpop.f32.mrb[17].mxu1 }
 0x1bd   :  { %v368_v60 = vadd.f32 %v1075_v56, %v367_v59 }
 0x1be   :  { %v447_v63 = vmax.f32 %v373_v58, 0.0 }
 0x1bf   :  { %v446_v61 = vmax.f32 %v368_v60, 0.0  ;;  %v1313_v62 = vpop.f32.mrb[18].mxu1 }
 0x1c0   :  { %v383_v0 = vadd.f32 %v1313_v62, %v1075_v56  ;;  %v377_v1 = vpop.f32.mrb[19].mxu1 }
 0x1c1   :  { %v378_v2 = vadd.f32 %v1075_v56, %v377_v1  ;;  %1348 = vmatprep.mubr.msk.f32.mxu0 %vm477_vm1, %v446_v61 }
 0x1c2   :  { %v449_v3 = vmax.f32 %v383_v0, 0.0  ;;  %1349 = vmatmul.mubr.msk.f32.vlgmr.msra.gmra.mrb[0].mxu0 %vm477_vm1, %v447_v63 }
 0x1c3   :  { %v448_v4 = vmax.f32 %v378_v2, 0.0  ;;  %v1316_v5 = vpop.f32.mrb[20].mxu1 }
 0x1c4   :  { %v393_v6 = vadd.f32 %v1316_v5, %v1075_v56  ;;  %v387_v7 = vpop.f32.mrb[21].mxu1 }
 0x1c5   :  { %v388_v8 = vadd.f32 %v1075_v56, %v387_v7  ;;  %1351 = vmatprep.mubr.msk.f32.mxu0 %vm477_vm1, %v448_v4 }
 0x1c6   :  { %v451_v9 = vmax.f32 %v393_v6, 0.0  ;;  %1352 = vmatmul.mubr.msk.f32.gmra.mrb[2].mxu0 %vm477_vm1, %v449_v3 }
 0x1c7   :  { %v450_v10 = vmax.f32 %v388_v8, 0.0  ;;  %v1319_v11 = vpop.f32.mrb[22].mxu1 }
 0x1c8   :  { %v403_v12 = vadd.f32 %v1319_v11, %v1075_v56  ;;  %v397_v13 = vpop.f32.mrb[23].mxu1 }
 0x1c9   :  { %1354 = vmatprep.mubr.msk.f32.mxu0 %vm477_vm1, %v450_v10  ;;  %v398_v14 = vadd.f32 %v1075_v56, %v397_v13 }
 0x1ca   :  { %1355 = vmatmul.mubr.msk.f32.gmra.mrb[4].mxu0 %vm477_vm1, %v451_v9  ;;  %v453_v15 = vmax.f32 %v403_v12, 0.0 }
 0x1cb   :  { %v452_v16 = vmax.f32 %v398_v14, 0.0  ;;  %v1322_v17 = vpop.f32.mrb[24].mxu1 }
 0x1cc   :  { %v413_v18 = vadd.f32 %v1322_v17, %v1075_v56  ;;  %v407_v19 = vpop.f32.mrb[25].mxu1 }
 0x1cd   :  { %1357 = vmatprep.mubr.msk.f32.mxu0 %vm477_vm1, %v452_v16  ;;  %v408_v20 = vadd.f32 %v1075_v56, %v407_v19 }
 0x1ce   :  { %1358 = vmatmul.mubr.msk.f32.gmra.mrb[6].mxu0 %vm477_vm1, %v453_v15  ;;  %v455_v21 = vmax.f32 %v413_v18, 0.0 }
 0x1cf   :  { %v454_v22 = vmax.f32 %v408_v20, 0.0  ;;  %v1325_v23 = vpop.f32.mrb[26].mxu1 }
 0x1d0   :  { %v423_v24 = vadd.f32 %v1325_v23, %v1075_v56  ;;  %v417_v25 = vpop.f32.mrb[27].mxu1 }
 0x1d1   :  { %1360 = vmatprep.mubr.msk.f32.mxu0 %vm477_vm1, %v454_v22  ;;  %v418_v26 = vadd.f32 %v1075_v56, %v417_v25 }
 0x1d2   :  { %1361 = vmatmul.mubr.msk.f32.gmra.mrb[8].mxu0 %vm477_vm1, %v455_v21  ;;  %v457_v27 = vmax.f32 %v423_v24, 0.0 }
 0x1d3   :  { %v456_v28 = vmax.f32 %v418_v26, 0.0  ;;  %v1328_v29 = vpop.f32.mrb[28].mxu1  ;;  %v1581_v26 = vmov 0.0|0.0  }
 0x1d4   :  { %v433_v30 = vadd.f32 %v1328_v29, %v1075_v56  ;;  %v427_v31 = vpop.f32.mrb[29].mxu1  ;;  %1519 = vmatprep.subr.bf16.mxu0 %v1581_v26  ;;  %v1584_v29 = vmov 0  }
 0x1d5   :  { %1363 = vmatprep.mubr.msk.f32.mxu0 %vm477_vm1, %v456_v28  ;;  %v428_v32 = vadd.f32 %v1075_v56, %v427_v31  ;;  %v912_v28 = vld [vmem:[#allocation2] sm:$0x1]  ;;  %1556 = vset.pattern.permute.xlu0 %v1584_v29 }
 0x1d6   :  { %1364 = vmatmul.mubr.msk.f32.gmra.mrb[10].mxu0 %vm477_vm1, %v457_v27  ;;  %v459_v33 = vmax.f32 %v433_v30, 0.0  ;;  %v1583_v27 = vmov 0.0   ;;  %915 = vperm.xlu0 %1556, %v912_v28   ;;  %v1093_v30 = vld [vmem:[%s1919_s8] ss:$0 sm:$0xff] }
 0x1d7   :  { %v458_v34 = vmax.f32 %v428_v32, 0.0  ;;  %v1331_v35 = vpop.f32.mrb[30].mxu1 }
 0x1d8   :  { %v443_v36 = vadd.f32 %v1331_v35, %v1075_v56  ;;  %v437_v37 = vpop.f32.mrb[31].mxu1 }
 0x1d9   :  { %1366 = vmatprep.mubr.msk.f32.mxu0 %vm477_vm1, %v458_v34  ;;  %v438_v38 = vadd.f32 %v1075_v56, %v437_v37 }
 0x1da   :  { %1367 = vmatmul.mubr.msk.f32.gmra.mrb[12].mxu0 %vm477_vm1, %v459_v33  ;;  %v461_v39 = vmax.f32 %v443_v36, 0.0 }
 0x1db   :  { %v460_v40 = vmax.f32 %v438_v38, 0.0 }
 0x1dd   :  { %1369 = vmatprep.mubr.msk.f32.mxu0 %vm477_vm1, %v460_v40 }
 0x1de   :  { %1370 = vmatmul.mubr.msk.f32.gmra.mrb[14].mxu0 %vm477_vm1, %v461_v39 }
 0x1df   :  { %1444 = vmatprep.mubr.msk.f32.mxu0 %vm1582_vm2, %v1583_v27 }
 0x255   :  { %v916_v29 = vpop.permute.xlu0 %915 }
 0x295   :  { %v1350_v42 = vpop.f32.mrb[0].mxu0 }
 0x296   :  { %v598_v43 = vadd.f32 %v1350_v42, %v1076_v41  ;;  %v592_v44 = vpop.f32.mrb[1].mxu0 }
 0x297   :  { %v593_v45 = vadd.f32 %v1076_v41, %v592_v44 }
 0x298   :  { %v672_v48 = vmax.f32 %v598_v43, 0.0 }
 0x299   :  { %v671_v46 = vmax.f32 %v593_v45, 0.0  ;;  %v1353_v47 = vpop.f32.mrb[2].mxu0 }
 0x29a   :  { %v608_v49 = vadd.f32 %v1353_v47, %v1076_v41  ;;  %v602_v50 = vpop.f32.mrb[3].mxu0 }
 0x29b   :  { %v603_v51 = vadd.f32 %v1076_v41, %v602_v50  ;;  %1388 = vmatprep.mubr.msk.f32.mxu1 %vm477_vm1, %v671_v46 }
 0x29c   :  { %1389 = vmatmul.mubr.msk.f32.vlgmr.msra.gmra.mrb[32].mxu1 %vm477_vm1, %v672_v48  ;;  %v674_v54 = vmax.f32 %v608_v49, 0.0 }
 0x29d   :  { %v673_v52 = vmax.f32 %v603_v51, 0.0  ;;  %v1356_v53 = vpop.f32.mrb[4].mxu0 }
 0x29e   :  { %v618_v55 = vadd.f32 %v1356_v53, %v1076_v41  ;;  %v612_v56 = vpop.f32.mrb[5].mxu0 }
 0x29f   :  { %v613_v57 = vadd.f32 %v1076_v41, %v612_v56  ;;  %1391 = vmatprep.mubr.msk.f32.mxu1 %vm477_vm1, %v673_v52 }
 0x2a0   :  { %v676_v58 = vmax.f32 %v618_v55, 0.0  ;;  %1392 = vmatmul.mubr.msk.f32.gmra.mrb[34].mxu1 %vm477_vm1, %v674_v54 }
 0x2a1   :  { %v675_v59 = vmax.f32 %v613_v57, 0.0  ;;  %v1359_v60 = vpop.f32.mrb[6].mxu0 }
 0x2a2   :  { %v628_v61 = vadd.f32 %v1359_v60, %v1076_v41  ;;  %v622_v62 = vpop.f32.mrb[7].mxu0 }
 0x2a3   :  { %1394 = vmatprep.mubr.msk.f32.mxu1 %vm477_vm1, %v675_v59  ;;  %v623_v63 = vadd.f32 %v1076_v41, %v622_v62 }
 0x2a4   :  { %1395 = vmatmul.mubr.msk.f32.gmra.mrb[36].mxu1 %vm477_vm1, %v676_v58  ;;  %v678_v0 = vmax.f32 %v628_v61, 0.0 }
 0x2a5   :  { %v677_v1 = vmax.f32 %v623_v63, 0.0  ;;  %v1362_v2 = vpop.f32.mrb[8].mxu0 }
 0x2a6   :  { %v638_v3 = vadd.f32 %v1362_v2, %v1076_v41  ;;  %v632_v4 = vpop.f32.mrb[9].mxu0 }
 0x2a7   :  { %1397 = vmatprep.mubr.msk.f32.mxu1 %vm477_vm1, %v677_v1  ;;  %v633_v5 = vadd.f32 %v1076_v41, %v632_v4 }
 0x2a8   :  { %1398 = vmatmul.mubr.msk.f32.gmra.mrb[38].mxu1 %vm477_vm1, %v678_v0  ;;  %v680_v6 = vmax.f32 %v638_v3, 0.0 }
 0x2a9   :  { %v679_v7 = vmax.f32 %v633_v5, 0.0  ;;  %v1365_v8 = vpop.f32.mrb[10].mxu0 }
 0x2aa   :  { %v648_v9 = vadd.f32 %v1365_v8, %v1076_v41  ;;  %v642_v10 = vpop.f32.mrb[11].mxu0 }
 0x2ab   :  { %1400 = vmatprep.mubr.msk.f32.mxu1 %vm477_vm1, %v679_v7  ;;  %v643_v11 = vadd.f32 %v1076_v41, %v642_v10 }
 0x2ac   :  { %1401 = vmatmul.mubr.msk.f32.gmra.mrb[40].mxu1 %vm477_vm1, %v680_v6  ;;  %v682_v12 = vmax.f32 %v648_v9, 0.0 }
 0x2ad   :  { %v681_v13 = vmax.f32 %v643_v11, 0.0  ;;  %v1368_v14 = vpop.f32.mrb[12].mxu0 }
 0x2ae   :  { %v658_v15 = vadd.f32 %v1368_v14, %v1076_v41  ;;  %v652_v16 = vpop.f32.mrb[13].mxu0 }
 0x2af   :  { %1403 = vmatprep.mubr.msk.f32.mxu1 %vm477_vm1, %v681_v13  ;;  %v653_v17 = vadd.f32 %v1076_v41, %v652_v16 }
 0x2b0   :  { %1404 = vmatmul.mubr.msk.f32.gmra.mrb[42].mxu1 %vm477_vm1, %v682_v12  ;;  %v684_v18 = vmax.f32 %v658_v15, 0.0 }
 0x2b1   :  { %v683_v19 = vmax.f32 %v653_v17, 0.0  ;;  %v1371_v20 = vpop.f32.mrb[14].mxu0 }
 0x2b2   :  { %v668_v21 = vadd.f32 %v1371_v20, %v1076_v41  ;;  %v662_v22 = vpop.f32.mrb[15].mxu0 }
 0x2b3   :  { %1406 = vmatprep.mubr.msk.f32.mxu1 %vm477_vm1, %v683_v19  ;;  %v663_v23 = vadd.f32 %v1076_v41, %v662_v22 }
 0x2b4   :  { %1407 = vmatmul.mubr.msk.f32.gmra.mrb[44].mxu1 %vm477_vm1, %v684_v18  ;;  %v686_v24 = vmax.f32 %v668_v21, 0.0 }
 0x2b5   :  { %v685_v25 = vmax.f32 %v663_v23, 0.0 }
 0x2b7   :  { %1409 = vmatprep.mubr.msk.f32.mxu1 %vm477_vm1, %v685_v25  ;;  %v918_v25 = vlaneseq }
 0x2b8   :  { %1410 = vmatmul.mubr.msk.f32.gmra.mrb[46].mxu1 %vm477_vm1, %v686_v24  ;;  %v911_v24 = vld [vmem:[%s1920_s9] sm:$0x1] }
 0x2b9   :  { %v919_v27 = vshrl.u32 %v918_v25, 7 }
 0x2bb   :  { %v920_v28 = vsub.s32 0, %v919_v27 }
 0x36f   :  { %v1390_v31 = vpop.f32.mrb[32].mxu1 }
 0x370   :  { %v822_v32 = vadd.f32 %v1390_v31, %v1093_v30  ;;  %v816_v33 = vpop.f32.mrb[33].mxu1 }
 0x371   :  { %v817_v34 = vadd.f32 %v1093_v30, %v816_v33 }
 0x372   :  { %v896_v35 = vmax.f32 %v822_v32, 0.0 }
 0x373   :  { %v895_v36 = vmax.f32 %v817_v34, 0.0  ;;  %v1393_v37 = vpop.f32.mrb[34].mxu1 }
 0x374   :  { %v832_v38 = vadd.f32 %v1393_v37, %v1093_v30  ;;  %v826_v39 = vpop.f32.mrb[35].mxu1 }
 0x375   :  { %v1520_v41 = vpack.c.bf16 %v896_v35, %v895_v36  ;;  %v827_v42 = vadd.f32 %v1093_v30, %v826_v39 }
 0x376   :  { %v898_v43 = vmax.f32 %v832_v38, 0.0 }
 0x377   :  { %v897_v44 = vmax.f32 %v827_v42, 0.0  ;;  %1522 = vmatpush3.bf16.xpose.msk.msra.mxu0 %vm1868_vm3, %v1520_v41  ;;  %v1396_v45 = vpop.f32.mrb[36].mxu1 }
 0x378   :  { %v842_v46 = vadd.f32 %v1396_v45, %v1093_v30  ;;  %v836_v47 = vpop.f32.mrb[37].mxu1  ;;  %1523 = vmatprep.subr.bf16.mxu0 %v1581_v26 }
 0x379   :  { %v1524_v48 = vpack.c.bf16 %v898_v43, %v897_v44  ;;  %v837_v49 = vadd.f32 %v1093_v30, %v836_v47 }
 0x37a   :  { %v900_v50 = vmax.f32 %v842_v46, 0.0 }
 0x37b   :  { %v899_v51 = vmax.f32 %v837_v49, 0.0  ;;  %v1399_v52 = vpop.f32.mrb[38].mxu1 }
 0x37c   :  { %v852_v53 = vadd.f32 %v1399_v52, %v1093_v30  ;;  %v846_v54 = vpop.f32.mrb[39].mxu1 }
 0x37d   :  { %v1528_v55 = vpack.c.bf16 %v900_v50, %v899_v51  ;;  %v847_v56 = vadd.f32 %v1093_v30, %v846_v54 }
 0x37e   :  { %v902_v57 = vmax.f32 %v852_v53, 0.0 }
 0x37f   :  { %1526 = vmatpush3.bf16.xpose.msk.msra.mxu0 %vm1868_vm3, %v1524_v48  ;;  %v901_v58 = vmax.f32 %v847_v56, 0.0  ;;  %v1402_v59 = vpop.f32.mrb[40].mxu1 }
 0x380   :  { %1527 = vmatprep.subr.bf16.mxu0 %v1581_v26  ;;  %v862_v60 = vadd.f32 %v1402_v59, %v1093_v30  ;;  %v856_v61 = vpop.f32.mrb[41].mxu1 }
 0x381   :  { %v1532_v62 = vpack.c.bf16 %v902_v57, %v901_v58  ;;  %v857_v63 = vadd.f32 %v1093_v30, %v856_v61 }
 0x382   :  { %v904_v0 = vmax.f32 %v862_v60, 0.0 }
 0x383   :  { %v903_v1 = vmax.f32 %v857_v63, 0.0  ;;  %v1405_v2 = vpop.f32.mrb[42].mxu1 }
 0x384   :  { %v872_v3 = vadd.f32 %v1405_v2, %v1093_v30  ;;  %v866_v4 = vpop.f32.mrb[43].mxu1 }
 0x385   :  { %v1536_v5 = vpack.c.bf16 %v904_v0, %v903_v1  ;;  %v867_v6 = vadd.f32 %v1093_v30, %v866_v4 }
 0x386   :  { %v906_v7 = vmax.f32 %v872_v3, 0.0 }
 0x387   :  { %1530 = vmatpush3.bf16.xpose.msk.msra.mxu0 %vm1868_vm3, %v1528_v55  ;;  %v905_v8 = vmax.f32 %v867_v6, 0.0  ;;  %v1408_v9 = vpop.f32.mrb[44].mxu1 }
 0x388   :  { %1531 = vmatprep.subr.bf16.mxu0 %v1581_v26  ;;  %v882_v10 = vadd.f32 %v1408_v9, %v1093_v30  ;;  %v876_v11 = vpop.f32.mrb[45].mxu1 }
 0x389   :  { %v1540_v12 = vpack.c.bf16 %v906_v7, %v905_v8  ;;  %v877_v13 = vadd.f32 %v1093_v30, %v876_v11 }
 0x38a   :  { %v908_v14 = vmax.f32 %v882_v10, 0.0 }
 0x38b   :  { %v907_v15 = vmax.f32 %v877_v13, 0.0  ;;  %v1411_v16 = vpop.f32.mrb[46].mxu1 }
 0x38c   :  { %v892_v17 = vadd.f32 %v1411_v16, %v1093_v30  ;;  %v886_v18 = vpop.f32.mrb[47].mxu1 }
 0x38d   :  { %v1544_v19 = vpack.c.bf16 %v908_v14, %v907_v15  ;;  %v887_v20 = vadd.f32 %v1093_v30, %v886_v18  ;;  %v921_v30 = vrot.slane %v916_v29, %v920_v28 }
 0x38e   :  { %v910_v21 = vmax.f32 %v892_v17, 0.0 }
 0x38f   :  { %1534 = vmatpush3.bf16.xpose.msk.msra.mxu0 %vm1868_vm3, %v1532_v62  ;;  %v909_v22 = vmax.f32 %v887_v20, 0.0 }
 0x390   :  { %1535 = vmatprep.subr.bf16.mxu0 %v1581_v26 }
 0x391   :  { %v1548_v23 = vpack.c.bf16 %v910_v21, %v909_v22 }
 0x397   :  { %1538 = vmatpush3.bf16.xpose.msk.msra.mxu0 %vm1868_vm3, %v1536_v5 }
 0x398   :  { %1539 = vmatprep.subr.bf16.mxu0 %v1581_v26 }
 0x39f   :  { %1542 = vmatpush3.bf16.xpose.msk.msra.mxu0 %vm1868_vm3, %v1540_v12 }
 0x3a0   :  { %1543 = vmatprep.subr.bf16.mxu0 %v1581_v26 }
 0x3a7   :  { %1546 = vmatpush3.bf16.xpose.msk.msra.mxu0 %vm1868_vm3, %v1544_v19 }
 0x3a8   :  { %1547 = vmatprep.subr.bf16.mxu0 %v1581_v26 }
 0x3af   :  { %1550 = vmatpush3.bf16.xpose.msk.msra.mxu0 %vm1868_vm3, %v1548_v23 }
 0x3b6   :  { %1445 = vmatmul.mubr.msk.f32.vlgmr.msra.gmra.mrb[16].mxu0 %vm477_vm1, %v911_v24 }
 0x489   :  { %v1039_v31 = vpop.f32.mrb[16].mxu0 }
 0x48a   :  { %v1040_v32 = vadd.f32 %v1039_v31, %v921_v30  ;;  %v1446_v33 = vpop.f32.mrb[17].mxu0 }
 0x48c   :  { %1043 = vst [vmem:[#allocation3] sm:$0x1] %v1040_v32 }
 0x48d   :  { %1568 = shalt.err (!%p1565_p4)
}
 0x48e   :  { %s1569_s22 = scalar_lea.hbm %s1922_s11, 16 }
 0x48f   :  { %p1570_p5 = scmp.ne.s32.totalorder %s1922_s11, %s1569_s22  ;;  %p1573_p6 = scmp.lt.u32.totalorder %s1569_s22, %s1922_s11 }
 0x491   :  { %p1575_p7 = pnand %p1573_p6, %p1570_p5 }
 0x493   :  { %1578 = shalt.err (!%p1575_p7)
}
 0x494   :  { %1053 = dma.vmem_to_hbm [thread:$0]  %s1051_s2, 16, %s1922_s11, [#allocation4]  }
 0x495   :  { %1579 = dma.done.wait [#allocation4], 16  }
 0x496   :  { %1580 = vsyncadd [#allocation4], 4294967280 }
 0x497   :  { %1057 = vsyncpa [#allocation4], 1 }

</bundles_post_ra>
